<compile_context>
chip_gen: v7x
topology: tpu7x:2x2x1
jax: 0.10.0
libtpu: 0.0.40
codegen_flags: <defaults>
</compile_context>

<pallas_src>
import math

import jax
import jax.numpy as jnp
from jax.experimental import pallas as pl
from jax.experimental.pallas import tpu as pltpu

EPS = 1e-5
INV_SQRT2 = 0.7071067811865476
SQRT_2_OVER_PI = 0.7978845608028654
MXU_DTYPE = jnp.bfloat16            # MXU operand dtype; accumulation stays f32


# ------------------------------------------------------------------ config

def _vmem_budget_bytes():
    """Generation-aware VMEM budget: ~75% of physical, clamped to [32,112] MiB."""
    try:
        cap = int(pltpu.get_tpu_info().vmem_capacity_bytes)
    except Exception:
        return 48 * 1024 * 1024      # safe default on every generation (v7x=64MiB)
    return max(32 * 1024 * 1024, min(cap * 3 // 4, 112 * 1024 * 1024))


VMEM_LIMIT = _vmem_budget_bytes()
# v5e/v6e (128 MiB VMEM) afford tm~512 f32 row blocks; v7x (64 MiB) stays ~256.
TM_TARGET = 512 if VMEM_LIMIT >= 80 * 1024 * 1024 else 256


# ------------------------------------------------------------------ helpers

def _pick_tile(dim, target, align):
    """Largest tile <= target that divides dim and is a multiple of align,
    falling back to the full dim (always legal for BlockSpec)."""
    if dim <= target:
        return dim
    t = (target // align) * align
    while t >= align:
        if dim % t == 0:
            return t
        t -= align
    return dim


def _ln(x):
    """LayerNorm (no affine), f32, over last axis."""
    mean = jnp.mean(x, axis=-1, keepdims=True)
    c = x - mean
    var = jnp.mean(c * c, axis=-1, keepdims=True)
    return c * jax.lax.rsqrt(var + EPS)


def _gelu_tanh(x):
    # tanh-form GELU: tanh lowers to the EUP slot (per perf review); max abs
    # deviation from exact-erf GELU is ~1e-3 and covered by the tolerances.
    return 0.5 * x * (1.0 + jnp.tanh(SQRT_2_OVER_PI * (x + 0.044715 * x * x * x)))


# ------------------------------------------------------------------ kernels

def _layernorm_kernel(x_ref, o_ref):
    o_ref[...] = _ln(x_ref[...])


def layernorm(x2d):
    """Standalone LayerNorm (input LN only) over [rows, D], large row blocks."""
    R, D = x2d.shape
    blk = _pick_tile(R, 1024, 8)
    return pl.pallas_call(
        _layernorm_kernel,
        out_shape=jax.ShapeDtypeStruct((R, D), jnp.float32),
        grid=(R // blk,),
        in_specs=[pl.BlockSpec((blk, D), lambda i: (i, 0))],
        out_specs=pl.BlockSpec((blk, D), lambda i: (i, 0)),
        compiler_params=pltpu.CompilerParams(
            dimension_semantics=("parallel",),
            vmem_limit_bytes=VMEM_LIMIT),
    )(x2d)


def _ln_matmul_kernel(x_ref, w_ref, o_ref, h_sc):
    # LN needs the full feature row, so K (= d_model) is not tiled.
    # LN(x) -> bf16 is computed once per row block and cached across N tiles.
    @pl.when(pl.program_id(1) == 0)
    def _():
        h_sc[...] = _ln(x_ref[...]).astype(MXU_DTYPE)

    o_ref[...] = jnp.dot(h_sc[...], w_ref[...],
                         preferred_element_type=jnp.float32).astype(o_ref.dtype)


def ln_matmul(x, w, *, tm_target=TM_TARGET, tn_target=512):
    """Fused LayerNorm(x) @ W; W is bf16 [D, N]; output bf16."""
    M, D = x.shape
    _, N = w.shape
    tm = _pick_tile(M, tm_target, 16)       # 16: bf16 sublane tile on the output
    tn = _pick_tile(N, tn_target, 128)
    return pl.pallas_call(
        _ln_matmul_kernel,
        out_shape=jax.ShapeDtypeStruct((M, N), MXU_DTYPE),
        grid=(M // tm, N // tn),
        in_specs=[pl.BlockSpec((tm, D), lambda i, j: (i, 0)),
                  pl.BlockSpec((D, tn), lambda i, j: (0, j))],
        out_specs=pl.BlockSpec((tm, tn), lambda i, j: (i, j)),
        scratch_shapes=[pltpu.VMEM((tm, D), MXU_DTYPE)],
        compiler_params=pltpu.CompilerParams(
            # N axis is "arbitrary": the cached LN scratch carries across it.
            dimension_semantics=("parallel", "arbitrary"),
            vmem_limit_bytes=VMEM_LIMIT),
    )(x, w)


def _make_attn_kernel(H, Hkv, hd, q_per_kv, tq, tkv):
    """Flash-tiled RoPE + per-head LN + GQA attention + out-proj + residual."""
    scale = 1.0 / math.sqrt(hd)
    half = hd // 2

    def rope_norm(t, cos, sin):
        # rotate-half layout (weights deinterleaved on host): pair-swap is a
        # half-slice swap (lane shuffle), not an MXU permutation matmul.
        t1 = t[:, :half]
        t2 = t[:, half:]
        r = jnp.concatenate([t1 * cos - t2 * sin, t2 * cos + t1 * sin], axis=-1)
        return _ln(r)

    def kernel(q_ref, kv_ref, res_ref, wo_ref, cq_ref, sq_ref, ck_ref, sk_ref,
               o_ref, q_sc, m_sc, l_sc, acc_sc):
        ki = pl.program_id(2)
        nk = pl.num_programs(2)

        @pl.when(ki == 0)
        def _():
            # init online-softmax state and cache rope+norm'd, pre-scaled q
            # (stacked per KV group) for reuse across kv tiles.
            m_sc[...] = jnp.full(m_sc.shape, -jnp.inf, jnp.float32)
            l_sc[...] = jnp.zeros(l_sc.shape, jnp.float32)
            acc_sc[...] = jnp.zeros(acc_sc.shape, jnp.float32)
            qb = q_ref[0].astype(jnp.float32)            # [tq, H*hd]
            cq, sq = cq_ref[...], sq_ref[...]
            for g in range(Hkv):
                rows = [rope_norm(qb[:, (g * q_per_kv + j) * hd:
                                         (g * q_per_kv + j + 1) * hd], cq, sq)
                        for j in range(q_per_kv)]
                qg = jnp.concatenate(rows, axis=0) * scale   # scale folded here
                q_sc[g] = qg.astype(q_sc.dtype)

        kvb = kv_ref[0]                                   # [tkv, 2*Hkv*hd] bf16
        ck, sk = ck_ref[...], sk_ref[...]
        for g in range(Hkv):
            kg = rope_norm(kvb[:, g * hd:(g + 1) * hd].astype(jnp.float32),
                           ck, sk).astype(MXU_DTYPE)              # [tkv, hd]
            vg = kvb[:, (Hkv + g) * hd:(Hkv + g + 1) * hd]        # [tkv, hd] bf16
            # one stacked matmul per KV group: [q_per_kv*tq, hd] x [tkv, hd]^T
            s = jax.lax.dot_general(q_sc[g], kg, (((1,), (1,)), ((), ())),
                                    preferred_element_type=jnp.float32)
            m_prev = m_sc[g]
            m_new = jnp.maximum(m_prev, jnp.max(s, axis=-1, keepdims=True))
            alpha = jnp.exp(m_prev - m_new)
            p = jnp.exp(s - m_new)
            l_sc[g] = alpha * l_sc[g] + jnp.sum(p, axis=-1, keepdims=True)
            acc_sc[g] = alpha * acc_sc[g] + jnp.dot(
                p.astype(MXU_DTYPE), vg, preferred_element_type=jnp.float32)
            m_sc[g] = m_new

        @pl.when(ki == nk - 1)
        def _():
            outs = []
            for g in range(Hkv):
                og = acc_sc[g] * pl.reciprocal(l_sc[g], approx=True)  # EUP recip
                for j in range(q_per_kv):
                    outs.append(og[j * tq:(j + 1) * tq, :])
            attn = jnp.concatenate(outs, axis=-1).astype(MXU_DTYPE)   # [tq, H*hd]
            o_ref[0] = res_ref[0] + jnp.dot(attn, wo_ref[...],
                                            preferred_element_type=jnp.float32)

    return kernel


def attention_block(q3, kv3, resid3, wo, cos, sin, H, Hkv, hd,
                    *, tq_target=256, tkv_target=512):
    B, S, NQ = q3.shape
    NKV = kv3.shape[-1]
    D = resid3.shape[-1]
    q_per_kv = H // Hkv
    half = hd // 2
    tq = _pick_tile(S, tq_target, 16)
    tkv = _pick_tile(S, tkv_target, 16)
    kernel = _make_attn_kernel(H, Hkv, hd, q_per_kv, tq, tkv)
    return pl.pallas_call(
        kernel,
        out_shape=jax.ShapeDtypeStruct((B, S, D), jnp.float32),
        grid=(B, S // tq, S // tkv),
        in_specs=[
            pl.BlockSpec((1, tq, NQ), lambda b, qi, ki: (b, qi, 0)),
            pl.BlockSpec((1, tkv, NKV), lambda b, qi, ki: (b, ki, 0)),
            pl.BlockSpec((1, tq, D), lambda b, qi, ki: (b, qi, 0)),
            pl.BlockSpec((NQ, D), lambda b, qi, ki: (0, 0)),
            pl.BlockSpec((tq, half), lambda b, qi, ki: (qi, 0)),   # cos (q rows)
            pl.BlockSpec((tq, half), lambda b, qi, ki: (qi, 0)),   # sin (q rows)
            pl.BlockSpec((tkv, half), lambda b, qi, ki: (ki, 0)),  # cos (k rows)
            pl.BlockSpec((tkv, half), lambda b, qi, ki: (ki, 0)),  # sin (k rows)
        ],
        out_specs=pl.BlockSpec((1, tq, D), lambda b, qi, ki: (b, qi, 0)),
        scratch_shapes=[
            pltpu.VMEM((Hkv, q_per_kv * tq, hd), MXU_DTYPE),   # cached q
            pltpu.VMEM((Hkv, q_per_kv * tq, 1), jnp.float32),  # running max
            pltpu.VMEM((Hkv, q_per_kv * tq, 1), jnp.float32),  # running sum
            pltpu.VMEM((Hkv, q_per_kv * tq, hd), jnp.float32), # accumulator
        ],
        compiler_params=pltpu.CompilerParams(
            dimension_semantics=("parallel", "parallel", "arbitrary"),
            vmem_limit_bytes=VMEM_LIMIT),
    )(q3, kv3, resid3, wo, cos, sin, cos, sin)


def _ln_ffn_kernel(x_ref, w1_ref, w2_ref, o_ref, acc_ref, h_sc):
    f = pl.program_id(1)

    @pl.when(f == 0)
    def _():
        x = x_ref[...]
        acc_ref[...] = x                              # residual seeds the acc
        h_sc[...] = _ln(x).astype(MXU_DTYPE)          # LN cached across F tiles

    t = jnp.dot(h_sc[...], w1_ref[...], preferred_element_type=jnp.float32)
    g = _gelu_tanh(t)                                 # f32, tanh -> EUP
    acc_ref[...] += jnp.dot(g.astype(MXU_DTYPE), w2_ref[...],
                            preferred_element_type=jnp.float32)

    @pl.when(f == pl.num_programs(1) - 1)
    def _():
        o_ref[...] = acc_ref[...]


def ln_ffn(x, w1, w2, *, tm_target=TM_TARGET, tf_target=512):
    """x + gelu(LN(x) @ W1) @ W2, tiled over rows (parallel) and F (reduction)."""
    M, D = x.shape
    _, F = w1.shape
    tm = _pick_tile(M, tm_target, 8)
    tf = _pick_tile(F, tf_target, 128)
    return pl.pallas_call(
        _ln_ffn_kernel,
        out_shape=jax.ShapeDtypeStruct((M, D), jnp.float32),
        grid=(M // tm, F // tf),
        in_specs=[pl.BlockSpec((tm, D), lambda i, f: (i, 0)),
                  pl.BlockSpec((D, tf), lambda i, f: (0, f)),
                  pl.BlockSpec((tf, D), lambda i, f: (f, 0))],
        out_specs=pl.BlockSpec((tm, D), lambda i, f: (i, 0)),
        scratch_shapes=[pltpu.VMEM((tm, D), jnp.float32),
                        pltpu.VMEM((tm, D), MXU_DTYPE)],
        compiler_params=pltpu.CompilerParams(
            dimension_semantics=("parallel", "arbitrary"),
            vmem_limit_bytes=VMEM_LIMIT),
    )(x, w1, w2)


# ------------------------------------------------------------------ glue

def rope_constants(seq_len, head_dim, base=10000.0):
    """cos/sin for rotate-half layout: [S, head_dim//2] each."""
    half = head_dim // 2
    theta = 1.0 / (base ** (jnp.arange(half, dtype=jnp.float32) * 2.0 / head_dim))
    ang = jnp.arange(seq_len, dtype=jnp.float32)[:, None] * theta[None, :]
    return jnp.cos(ang), jnp.sin(ang)


def _deinterleave_heads(w, n_heads, hd):
    """Reorder each head's output columns from interleaved-pair to rotate-half
    layout ([even features | odd features]).  q.k and per-head LN are invariant
    to this shared permutation, so attention output is unchanged."""
    d_in = w.shape[0]
    w = w.reshape(d_in, n_heads, hd)
    w = jnp.concatenate([w[..., 0::2], w[..., 1::2]], axis=-1)
    return w.reshape(d_in, n_heads * hd)


def init_params(key, num_layers, d_model, nhead, num_kv_heads, head_dim,
                dim_feedforward):
    def lin(k, fan_in, fan_out):
        bound = 1.0 / math.sqrt(fan_in)
        return jax.random.uniform(k, (fan_in, fan_out), jnp.float32, -bound, bound)

    params = []
    for layer in range(num_layers):
        ks = jax.random.split(jax.random.fold_in(key, layer), 6)
        params.append(dict(
            wq=lin(ks[0], d_model, nhead * head_dim),
            wk=lin(ks[1], d_model, num_kv_heads * head_dim),
            wv=lin(ks[2], d_model, num_kv_heads * head_dim),
            wo=lin(ks[3], nhead * head_dim, d_model),
            w1=lin(ks[4], d_model, dim_feedforward),
            w2=lin(ks[5], dim_feedforward, d_model),
        ))
    return params


def prepare_layer_weights(params, nhead, num_kv_heads, head_dim):
    """Deinterleave Q/K head columns (rotate-half RoPE layout), concat K|V,
    and pre-cast all weights to bf16."""
    prepped = []
    for p in params:
        wq = _deinterleave_heads(p["wq"], nhead, head_dim)
        wk = _deinterleave_heads(p["wk"], num_kv_heads, head_dim)
        prepped.append(dict(
            wq=wq.astype(MXU_DTYPE),
            wkv=jnp.concatenate([wk, p["wv"]], axis=1).astype(MXU_DTYPE),
            wo=p["wo"].astype(MXU_DTYPE),
            w1=p["w1"].astype(MXU_DTYPE),
            w2=p["w2"].astype(MXU_DTYPE),
        ))
    return prepped


def encoder_forward(x, prepped, cos, sin, cfg):
    B, S, D = x.shape
    H, Hkv, hd = cfg["nhead"], cfg["num_kv_heads"], cfg["head_dim"]
    BS = B * S

    x2d = layernorm(x.reshape(BS, D))              # input LN (dropout = identity)
    for p in prepped:
        q2d = ln_matmul(x2d, p["wq"])              # fused pre-attn LN + Q proj (bf16)
        kv2d = ln_matmul(x2d, p["wkv"])            # fused pre-attn LN + K|V proj (bf16)
        x3 = attention_block(q2d.reshape(B, S, -1), kv2d.reshape(B, S, -1),
                             x2d.reshape(B, S, D), p["wo"], cos, sin,
                             H, Hkv, hd)           # flash attn + out-proj + residual
        x2d = x3.reshape(BS, D)
        x2d = ln_ffn(x2d, p["w1"], p["w2"])        # fused LN + FFN + residual
    return x2d.reshape(B, S, D)


# ------------------------------------------------------------------ reference

def ref_forward(x, params, cfg, mxu_dtype=jnp.float32):
    """Pure-JAX reference. mxu_dtype=f32 is the faithful spec; bf16 mirrors the
    kernel's MXU operand precision (f32 accumulation). Uses exact-erf GELU and
    interleaved-pair RoPE."""
    from jax.scipy.special import erf as jax_erf

    def mdot(a, b):
        return jnp.dot(a.astype(mxu_dtype), b.astype(mxu_dtype),
                       preferred_element_type=jnp.float32)

    B, S, D = x.shape
    H, Hkv, hd = cfg["nhead"], cfg["num_kv_heads"], cfg["head_dim"]
    half = hd // 2
    theta = 1.0 / (10000.0 ** (jnp.arange(half, dtype=jnp.float32) * 2.0 / hd))
    ang = jnp.arange(S, dtype=jnp.float32)[:, None] * theta[None, :]
    cos = jnp.cos(ang)[None, :, None, :]
    sin = jnp.sin(ang)[None, :, None, :]

    def rope(t):
        t0, t1 = t[..., 0::2], t[..., 1::2]
        return jnp.stack([t0 * cos - t1 * sin, t1 * cos + t0 * sin],
                         axis=-1).reshape(t.shape)

    x = _ln(x)
    for p in params:
        resid = x
        h = _ln(x)
        q = mdot(h, p["wq"]).reshape(B, S, H, hd)
        k = mdot(h, p["wk"]).reshape(B, S, Hkv, hd)
        v = mdot(h, p["wv"]).reshape(B, S, Hkv, hd)
        q = _ln(rope(q)).transpose(0, 2, 1, 3)
        k = _ln(rope(k)).transpose(0, 2, 1, 3)
        v = v.transpose(0, 2, 1, 3)
        rep = H // Hkv
        k = jnp.repeat(k, rep, axis=1)
        v = jnp.repeat(v, rep, axis=1)
        s = jnp.einsum("bhqd,bhkd->bhqk", q.astype(mxu_dtype), k.astype(mxu_dtype),
                       preferred_element_type=jnp.float32) / math.sqrt(hd)
        a = jax.nn.softmax(s, axis=-1)
        o = jnp.einsum("bhqk,bhkd->bhqd", a.astype(mxu_dtype), v.astype(mxu_dtype),
                       preferred_element_type=jnp.float32)
        o = o.transpose(0, 2, 1, 3).reshape(B, S, H * hd)
        x = resid + mdot(o, p["wo"])
        resid = x
        h = _ln(x)
        g = mdot(h, p["w1"])
        g = 0.5 * g * (1.0 + jax_erf(g * INV_SQRT2))
        x = resid + mdot(g, p["w2"])
    return x


# ------------------------------------------------------------------ main

if __name__ == "__main__":
    cfg = dict(num_layers=2, d_model=32, nhead=4, num_kv_heads=2, head_dim=16,
               dim_feedforward=64)
    B, S = 2, 8

    key = jax.random.PRNGKey(0)
    kx, kp = jax.random.split(key)
    x = jax.random.normal(kx, (B, S, cfg["d_model"]), jnp.float32)
    params = init_params(kp, **cfg)
    prepped = prepare_layer_weights(params, cfg["nhead"], cfg["num_kv_heads"],
                                    cfg["head_dim"])
    cos, sin = rope_constants(S, cfg["head_dim"])

    out = encoder_forward(x, prepped, cos, sin, cfg)
    out = jax.block_until_ready(out)
    assert out.shape == (B, S, cfg["d_model"])

    # Tight check vs a reference with matching MXU precision (bf16 operands,
    # f32 accumulation); looser sanity check vs the faithful f32 spec reference
    # (kernel uses bf16 MXU operands, tanh-GELU and an approx reciprocal, so
    # the spec tolerance is wider).
    ref_match = ref_forward(x, params, cfg, mxu_dtype=MXU_DTYPE)
    ref_spec = ref_forward(x, params, cfg, mxu_dtype=jnp.float32)
    err_match = float(jnp.max(jnp.abs(out - ref_match)))
    err_spec = float(jnp.max(jnp.abs(out - ref_spec)))
    assert err_match < 2e-2, f"max abs error vs matched-precision ref: {err_match}"
    assert err_spec < 6e-2, f"max abs error vs f32 spec reference: {err_spec}"

    print("KERNEL_OK")
</pallas_src>

<mosaic_0001>
module attributes {stable_mosaic.version = 11 : i64} {
  func.func @_layernorm_kernel(%arg0: i32, %arg1: memref<16x32xf32, #tpu.memory_space<vmem>>, %arg2: memref<16x32xf32, #tpu.memory_space<vmem>>) attributes {dimension_semantics = [#tpu.dimension_semantics<parallel>], iteration_bounds = array<i64: 1>, scalar_prefetch = 0 : i64, scratch_operands = 0 : i64, tpu.core_type = #tpu.core_type<tc>, window_params = [{transform_indices = @transform_0, window_bounds = array<i64: 16, 32>}, {transform_indices = @transform_1, window_bounds = array<i64: 16, 32>}]} {
    %c0 = arith.constant 0 : index
    %c0_0 = arith.constant 0 : index
    %0 = vector.load %arg1[%c0, %c0_0] : memref<16x32xf32, #tpu.memory_space<vmem>>, vector<16x32xf32>
    %cst = arith.constant dense<0.000000e+00> : vector<16xf32>
    %1 = vector.multi_reduction <add>, %0, %cst [1] : vector<16x32xf32> to vector<16xf32>
    %2 = vector.shape_cast %1 : vector<16xf32> to vector<16x1xf32>
    %cst_1 = arith.constant 3.200000e+01 : f32
    %3 = vector.broadcast %cst_1 : f32 to vector<16x1xf32>
    %4 = arith.divf %2, %3 : vector<16x1xf32>
    %5 = vector.broadcast %4 : vector<16x1xf32> to vector<16x32xf32>
    %6 = arith.subf %0, %5 : vector<16x32xf32>
    %7 = arith.mulf %6, %6 : vector<16x32xf32>
    %cst_2 = arith.constant dense<0.000000e+00> : vector<16xf32>
    %8 = vector.multi_reduction <add>, %7, %cst_2 [1] : vector<16x32xf32> to vector<16xf32>
    %9 = vector.shape_cast %8 : vector<16xf32> to vector<16x1xf32>
    %cst_3 = arith.constant 3.200000e+01 : f32
    %10 = vector.broadcast %cst_3 : f32 to vector<16x1xf32>
    %11 = arith.divf %9, %10 : vector<16x1xf32>
    %cst_4 = arith.constant 9.99999974E-6 : f32
    %12 = vector.broadcast %cst_4 : f32 to vector<16x1xf32>
    %13 = arith.addf %11, %12 : vector<16x1xf32>
    %14 = math.rsqrt %13 : vector<16x1xf32>
    %15 = vector.broadcast %14 : vector<16x1xf32> to vector<16x32xf32>
    %16 = arith.mulf %6, %15 : vector<16x32xf32>
    %c0_5 = arith.constant 0 : index
    %c0_6 = arith.constant 0 : index
    %17 = vector.load %arg2[%c0_5, %c0_6] : memref<16x32xf32, #tpu.memory_space<vmem>>, vector<16x32xf32>
    tpu.vector_store %arg2[%c0_5, %c0_6], %16 {strides = array<i32>} : memref<16x32xf32, #tpu.memory_space<vmem>>, vector<16x32xf32>,
    return
  }
  func.func @transform_0(%arg0: i32) -> (i32, i32) {
    %c0_i32 = arith.constant 0 : i32
    %c0_i32_0 = arith.constant 0 : i32
    return %arg0, %c0_i32 : i32, i32
  }
  func.func @transform_1(%arg0: i32) -> (i32, i32) {
    %c0_i32 = arith.constant 0 : i32
    %c0_i32_0 = arith.constant 0 : i32
    return %arg0, %c0_i32 : i32, i32
  }
}

</mosaic_0001>

<bundles_post_ra>
// kernel: tpu_custom_call.1
= control target key start
LH: loop header
LB: loop body
LE: loop exit
PB: predicated region body
PF: predicated region fallthrough
CT: control target
= control target key end

     0   :  { %6 = vsyncpa [#allocation3], 0  ;;  %s178_s0 = inlined_call_operand.hbm [shape: f32[16,32], index: 0, kind: input, shape index: {}]   ;;  %s179_s1 = inlined_call_operand.hbm [shape: f32[16,32], index: 1, kind: output, shape index: {}]  }
   0x1   :  { %7 = vsyncpa [#allocation4], 0  ;;  %s128_s6 = smov [#allocation2]   ;;  %s80_s10 = scalar_lea.hbm %s178_s0, 256 }
   0x2   :  { %s13_s7 = sshll.u32 %s128_s6, 4  ;;  %p81_p0 = scmp.ne.s32.totalorder %s178_s0, %s80_s10  ;;  %s14_s7 = int_to_ptr.vmem [resolvable:$true] %s13_s7 }
   0x3   :  { %p84_p1 = scmp.lt.u32.totalorder %s80_s10, %s178_s0 }
   0x5   :  { %p86_p2 = pnand %p84_p1, %p81_p0 }
   0x7   :  { %89 = shalt.err (!%p86_p2)
}
   0x8   :  { %s90_s15 = scalar_lea.vmem %s14_s7, 256  ;;  %p95_p4 = scmp.lt.s32.totalorder %s14_s7, %s14_s7 }
   0x9   :  { %p91_p3 = scmp.ne.s32.totalorder %s14_s7, %s90_s15  ;;  %p96_p5 = scmp.lt.s32.totalorder %s90_s15, %s90_s15 }
   0xb   :  { %p97_p6 = por %p96_p5, %p95_p4 }
   0xd   :  { %p98_p7 = pnand %p97_p6, %p91_p3 }
   0xf   :  { %101 = shalt.err (!%p98_p7)
}
  0x10   :  { %s129_s16 = smov 128   ;;  %s130_s17 = smov 8  }
  0x11   :  { %19 = dma.hbm_to_vmem [thread:$0]  %s178_s0, 256, %s14_s7, [#allocation3], %s129_s16, %s129_s16, %s130_s17  }
  0x12   :  { %124 = dma.done.wait [#allocation3], 256  }
  0x13   :  { %125 = vsyncadd [#allocation3], 4294967040  ;;  %vm25_vm0 = vcmask 261120   ;;  %v23_v0 = vld [vmem:[#allocation2] sm:$0xff]  ;;  %v24_v1 = vld [vmem:[#allocation2 + $0x8] sm:$0xff]  ;;  %s131_s0 = smov [#allocation5]  }
  0x14   :  { %v26_v2 = vsel %vm25_vm0, %v23_v0, 0.0  ;;  %v29_v3 = vsel %vm25_vm0, %v24_v1, 0.0  ;;  %s60_s20 = sshll.u32 %s131_s0, 4  ;;  %s61_s20 = int_to_ptr.vmem [resolvable:$true] %s60_s20 }
  0x15   :  { %27 = vadd.xlane.f32.xlu0 %v26_v2  ;;  %s102_s21 = scalar_lea.vmem %s61_s20, 256  ;;  %p107_p9 = scmp.lt.s32.totalorder %s61_s20, %s61_s20 }
  0x16   :  { %p103_p8 = scmp.ne.s32.totalorder %s61_s20, %s102_s21  ;;  %p108_p10 = scmp.lt.s32.totalorder %s102_s21, %s102_s21 }
  0x18   :  { %p109_p11 = por %p108_p10, %p107_p9 }
  0x19   :  { %30 = vadd.xlane.f32.xlu0 %v29_v3 }
  0x1a   :  { %p110_p12 = pnand %p109_p11, %p103_p8 }
  0xa2   :  { %v28_v4 = vpop.xlane.xlu0 %27 }
  0xa3   :  { %v33_v5 = vmul.f32 0.03125, %v28_v4 }
  0xa5   :  { %v35_v6 = vsub.f32 %v23_v0, %v33_v5 }
  0xa6   :  { %v31_v7 = vpop.xlane.xlu0 %30 }
  0xa7   :  { %v34_v8 = vmul.f32 0.03125, %v31_v7  ;;  %v37_v9 = vmul.f32 %v35_v6, %v35_v6 }
  0xa9   :  { %v36_v10 = vsub.f32 %v24_v1, %v34_v8  ;;  %v39_v11 = vsel %vm25_vm0, %v37_v9, 0.0 }
  0xaa   :  { %40 = vadd.xlane.f32.xlu1 %v39_v11 }
  0xab   :  { %v38_v12 = vmul.f32 %v36_v10, %v36_v10 }
  0xad   :  { %v42_v13 = vsel %vm25_vm0, %v38_v12, 0.0 }
  0xae   :  { %43 = vadd.xlane.f32.xlu1 %v42_v13 }
 0x137   :  { %v41_v14 = vpop.xlane.xlu1 %40 }
 0x138   :  { %v45_v15 = vmul.f32 0.03125, %v41_v14 }
 0x13a   :  { %v47_v16 = vadd.f32 1e-05, %v45_v15 }
 0x13b   :  { %v44_v17 = vpop.xlane.xlu1 %43 }
 0x13c   :  { %76 = vrsqrt.f32 %v47_v16  ;;  %v46_v18 = vmul.f32 0.03125, %v44_v17 }
 0x13e   :  { %v48_v19 = vadd.f32 1e-05, %v46_v18 }
 0x140   :  { %78 = vrsqrt.f32 %v48_v19 }
 0x146   :  { %v77_v20 = vpop.eup %76 }
 0x147   :  { %v51_v21 = vmul.f32 %v77_v20, %v35_v6 }
 0x149   :  { %53 = vst.msk [vmem:[#allocation5] sm:$0xff] %vm25_vm0, %v51_v21 }
 0x14a   :  { %v79_v22 = vpop.eup %78 }
 0x14b   :  { %v52_v23 = vmul.f32 %v79_v22, %v36_v10 }
 0x14d   :  { %54 = vst.msk [vmem:[#allocation5 + $0x8] sm:$0xff] %vm25_vm0, %v52_v23 }
 0x14e   :  { %113 = shalt.err (!%p110_p12)
}
 0x14f   :  { %s114_s24 = scalar_lea.hbm %s179_s1, 256 }
 0x150   :  { %p115_p13 = scmp.ne.s32.totalorder %s179_s1, %s114_s24  ;;  %p118_p0 = scmp.lt.u32.totalorder %s114_s24, %s179_s1 }
 0x152   :  { %p120_p1 = pnand %p118_p0, %p115_p13 }
 0x154   :  { %123 = shalt.err (!%p120_p1)
}
 0x155   :  { %66 = dma.vmem_to_hbm [thread:$0]  %s61_s20, 256, %s179_s1, [#allocation4], %s129_s16, %s129_s16, %s130_s17  }
 0x156   :  { %126 = dma.done.wait [#allocation4], 256  }
 0x157   :  { %127 = vsyncadd [#allocation4], 4294967040 }
 0x158   :  { %70 = vsyncpa [#allocation3], 1 }
 0x159   :  { %71 = vsyncpa [#allocation4], 1 }

</bundles_post_ra>
